<compile_context>
chip_gen: v7x
topology: tpu7x:2x2x1
jax: 0.10.0
libtpu: 0.0.40
codegen_flags: <defaults>
</compile_context>

<pallas_src>
import functools

import jax
import jax.numpy as jnp
from jax.experimental import pallas as pl
from jax.experimental.pallas import tpu as pltpu


# ------------------------------ fused kernel ------------------------------- #

def sepconv_kernel(x_ref, wt_ref, bias_ref, pwbd_ref, o_ref, xp_ref, *, H, W, Cin):
    """Fused fixed_padding + depthwise 3x3 (stride 1) + BN + pointwise 1x1.

    x_ref:    (1, H, W*Cin)     input slab, channels interleaved on lanes
    wt_ref:   (9, W*Cin)        per-tap depthwise weights (BN scale folded,
                                tiled across W)
    bias_ref: (1, W*Cin)        folded BN bias, tiled across W
    pwbd_ref: (W*Cin, W*Cout)   block-diagonal pointwise weight
    o_ref:    (1, H, W*Cout)    output slab (lane-dense: W*Cout = 128)
    xp_ref:   (H+2, (W+2)*Cin)  VMEM scratch holding the zero-padded input
    """
    WC = W * Cin

    # in-kernel fixed_padding (kernel 3, dilation 1 -> 1 zero pixel per side)
    xp_ref[...] = jnp.zeros_like(xp_ref)
    xp_ref[1:H + 1, Cin:Cin + WC] = x_ref[0]

    # depthwise 3x3, stride 1; BN scale already folded into the tap weights
    acc = jnp.zeros((H, WC), jnp.float32)
    for kh in range(3):
        for kw in range(3):
            tap = kh * 3 + kw
            sl = xp_ref[kh:kh + H, kw * Cin:kw * Cin + WC]      # (H, W*Cin)
            acc = acc + sl * wt_ref[tap:tap + 1, :]
    y = acc + bias_ref[...]                                     # BN bias

    # pointwise 1x1 conv as a block-diagonal matmul -> (H, W*Cout) lane-dense
    o_ref[0] = jnp.dot(y, pwbd_ref[...], preferred_element_type=jnp.float32)


# --------------------------------- wrapper --------------------------------- #

def separable_conv2d(x_nchw, params):
    """SeparableConv2d forward.  Accepts / returns NCHW like the PyTorch module."""
    dw_w, pw_w = params["dw_w"], params["pw_w"]
    bn_scale, bn_bias = params["bn_scale"], params["bn_bias"]

    N, Cin, H, W = x_nchw.shape
    Cout = pw_w.shape[1]

    # NCHW -> (N, H, W*Cin) channels-interleaved slabs (lane dim = W*Cin)
    x2d = jnp.transpose(x_nchw, (0, 2, 3, 1)).astype(jnp.float32)
    x2d = x2d.reshape(N, H, W * Cin)

    # fold BN scale into depthwise weights; tile tap weights / bias across W
    dw_f = (dw_w.astype(jnp.float32) * bn_scale[None, None, :]).reshape(9, Cin)
    wt = jnp.tile(dw_f, (1, W))                                    # (9, W*Cin)
    bias_t = jnp.tile(bn_bias.astype(jnp.float32), W)[None, :]     # (1, W*Cin)
    # block-diagonal pointwise weight: (W*Cin, W*Cout)
    pwbd = jnp.kron(jnp.eye(W, dtype=jnp.float32), pw_w.astype(jnp.float32))

    kern = functools.partial(sepconv_kernel, H=H, W=W, Cin=Cin)
    out2d = pl.pallas_call(
        kern,
        out_shape=jax.ShapeDtypeStruct((N, H, W * Cout), jnp.float32),
        grid=(N,),
        in_specs=[
            pl.BlockSpec((1, H, W * Cin), lambda n: (n, 0, 0)),
            pl.BlockSpec((9, W * Cin), lambda n: (0, 0)),
            pl.BlockSpec((1, W * Cin), lambda n: (0, 0)),
            pl.BlockSpec((W * Cin, W * Cout), lambda n: (0, 0)),
        ],
        out_specs=pl.BlockSpec((1, H, W * Cout), lambda n: (n, 0, 0)),
        scratch_shapes=[pltpu.VMEM((H + 2, (W + 2) * Cin), jnp.float32)],
        compiler_params=pltpu.CompilerParams(
            dimension_semantics=("parallel",)),
    )(x2d, wt, bias_t, pwbd)

    out = out2d.reshape(N, H, W, Cout)
    return jnp.transpose(out, (0, 3, 1, 2))                        # -> NCHW


# --------------------------- params / reference ---------------------------- #

def init_params(key, inplanes, planes, eps=1e-5):
    k1, k2, kb = jax.random.split(key, 3)
    kb1, kb2, kb3, kb4 = jax.random.split(kb, 4)
    dw_w = 0.2 * jax.random.normal(k1, (3, 3, inplanes), jnp.float32)
    pw_w = 0.2 * jax.random.normal(k2, (inplanes, planes), jnp.float32)
    gamma = 1.0 + 0.1 * jax.random.normal(kb1, (inplanes,), jnp.float32)
    beta = 0.1 * jax.random.normal(kb2, (inplanes,), jnp.float32)
    mean = 0.1 * jax.random.normal(kb3, (inplanes,), jnp.float32)
    var = jax.random.uniform(kb4, (inplanes,), jnp.float32, 0.5, 1.5)
    scale = gamma / jnp.sqrt(var + eps)
    bias = beta - mean * scale
    return {"dw_w": dw_w, "pw_w": pw_w, "bn_scale": scale, "bn_bias": bias}


def ref_separable_conv2d(x_nchw, params):
    """Pure-JAX reference (same math as the PyTorch module, no Pallas)."""
    x = jnp.transpose(x_nchw, (0, 2, 3, 1)).astype(jnp.float32)    # NHWC
    N, H, W, Cin = x.shape
    xp = jnp.pad(x, ((0, 0), (1, 1), (1, 1), (0, 0)))              # fixed_padding
    acc = jnp.zeros_like(x)
    for kh in range(3):
        for kw in range(3):
            acc = acc + xp[:, kh:kh + H, kw:kw + W, :] * params["dw_w"][kh, kw]
    y = acc * params["bn_scale"] + params["bn_bias"]               # BN (inference)
    out = jnp.einsum("nhwc,cd->nhwd", y, params["pw_w"],
                     preferred_element_type=jnp.float32)
    return jnp.transpose(out, (0, 3, 1, 2))


# ----------------------------------- main ----------------------------------- #

if __name__ == "__main__":
    key = jax.random.PRNGKey(0)
    kx, kp = jax.random.split(key)

    N, Cin, H, W = 2, 4, 16, 16
    planes = 8

    x = jax.random.normal(kx, (N, Cin, H, W), jnp.float32)
    params = init_params(kp, Cin, planes)

    # TODO(synk): BatchNorm is folded in inference mode (running stats);
    # PyTorch training-mode batch statistics are not reproduced.
    out = jax.jit(separable_conv2d)(x, params)
    out = jax.block_until_ready(out)

    ref = ref_separable_conv2d(x, params)
    assert out.shape == (N, planes, H, W), out.shape
    max_err = float(jnp.max(jnp.abs(out - ref)))
    assert jnp.allclose(out, ref, atol=2e-3, rtol=2e-3), max_err

    print("KERNEL_OK")
</pallas_src>

<mosaic_0001>
module attributes {stable_mosaic.version = 11 : i64} {
  func.func @sepconv_kernel(%arg0: i32, %arg1: memref<1x16x64xf32, #tpu.memory_space<vmem>>, %arg2: memref<9x64xf32, #tpu.memory_space<vmem>>, %arg3: memref<1x64xf32, #tpu.memory_space<vmem>>, %arg4: memref<64x128xf32, #tpu.memory_space<vmem>>, %arg5: memref<1x16x128xf32, #tpu.memory_space<vmem>>, %arg6: memref<18x72xf32, #tpu.memory_space<vmem>>) attributes {dimension_semantics = [#tpu.dimension_semantics<parallel>], iteration_bounds = array<i64: 2>, scalar_prefetch = 0 : i64, scratch_operands = 1 : i64, tpu.core_type = #tpu.core_type<tc>, window_params = [{transform_indices = @transform_0, window_bounds = array<i64: 1, 16, 64>}, {pipeline_mode = #tpu.pipeline_mode<synchronous>, transform_indices = @transform_1, window_bounds = array<i64: 9, 64>}, {pipeline_mode = #tpu.pipeline_mode<synchronous>, transform_indices = @transform_2, window_bounds = array<i64: 1, 64>}, {pipeline_mode = #tpu.pipeline_mode<synchronous>, transform_indices = @transform_3, window_bounds = array<i64: 64, 128>}, {transform_indices = @transform_4, window_bounds = array<i64: 1, 16, 128>}]} {
    %cst = arith.constant 0.000000e+00 : f32
    %0 = vector.broadcast %cst : f32 to vector<18x72xf32>
    %c0 = arith.constant 0 : index
    %c0_0 = arith.constant 0 : index
    %1 = vector.load %arg6[%c0, %c0_0] : memref<18x72xf32, #tpu.memory_space<vmem>>, vector<18x72xf32>
    tpu.vector_store %arg6[%c0, %c0_0], %0 {strides = array<i32>} : memref<18x72xf32, #tpu.memory_space<vmem>>, vector<18x72xf32>,
    %c0_1 = arith.constant 0 : index
    %c0_2 = arith.constant 0 : index
    %c0_3 = arith.constant 0 : index
    %2 = vector.load %arg1[%c0_1, %c0_2, %c0_3] : memref<1x16x64xf32, #tpu.memory_space<vmem>>, vector<1x16x64xf32>
    %3 = vector.shape_cast %2 : vector<1x16x64xf32> to vector<16x64xf32>
    %c1 = arith.constant 1 : index
    %c4 = arith.constant 4 : index
    %4 = vector.load %arg6[%c1, %c4] : memref<18x72xf32, #tpu.memory_space<vmem>>, vector<16x64xf32>
    tpu.vector_store %arg6[%c1, %c4], %3 {strides = array<i32>} : memref<18x72xf32, #tpu.memory_space<vmem>>, vector<16x64xf32>,
    %cst_4 = arith.constant 0.000000e+00 : f32
    %5 = vector.broadcast %cst_4 : f32 to vector<16x64xf32>
    %c0_5 = arith.constant 0 : index
    %c0_6 = arith.constant 0 : index
    %6 = vector.load %arg6[%c0_5, %c0_6] : memref<18x72xf32, #tpu.memory_space<vmem>>, vector<16x64xf32>
    %c0_7 = arith.constant 0 : index
    %c0_8 = arith.constant 0 : index
    %7 = vector.load %arg2[%c0_7, %c0_8] : memref<9x64xf32, #tpu.memory_space<vmem>>, vector<1x64xf32>
    %8 = vector.broadcast %7 : vector<1x64xf32> to vector<16x64xf32>
    %9 = arith.mulf %6, %8 : vector<16x64xf32>
    %10 = arith.addf %5, %9 : vector<16x64xf32>
    %c0_9 = arith.constant 0 : index
    %c4_10 = arith.constant 4 : index
    %11 = vector.load %arg6[%c0_9, %c4_10] : memref<18x72xf32, #tpu.memory_space<vmem>>, vector<16x64xf32>
    %c1_11 = arith.constant 1 : index
    %c0_12 = arith.constant 0 : index
    %12 = vector.load %arg2[%c1_11, %c0_12] : memref<9x64xf32, #tpu.memory_space<vmem>>, vector<1x64xf32>
    %13 = vector.broadcast %12 : vector<1x64xf32> to vector<16x64xf32>
    %14 = arith.mulf %11, %13 : vector<16x64xf32>
    %15 = arith.addf %10, %14 : vector<16x64xf32>
    %c0_13 = arith.constant 0 : index
    %c8 = arith.constant 8 : index
    %16 = vector.load %arg6[%c0_13, %c8] : memref<18x72xf32, #tpu.memory_space<vmem>>, vector<16x64xf32>
    %c2 = arith.constant 2 : index
    %c0_14 = arith.constant 0 : index
    %17 = vector.load %arg2[%c2, %c0_14] : memref<9x64xf32, #tpu.memory_space<vmem>>, vector<1x64xf32>
    %18 = vector.broadcast %17 : vector<1x64xf32> to vector<16x64xf32>
    %19 = arith.mulf %16, %18 : vector<16x64xf32>
    %20 = arith.addf %15, %19 : vector<16x64xf32>
    %c1_15 = arith.constant 1 : index
    %c0_16 = arith.constant 0 : index
    %21 = vector.load %arg6[%c1_15, %c0_16] : memref<18x72xf32, #tpu.memory_space<vmem>>, vector<16x64xf32>
    %c3 = arith.constant 3 : index
    %c0_17 = arith.constant 0 : index
    %22 = vector.load %arg2[%c3, %c0_17] : memref<9x64xf32, #tpu.memory_space<vmem>>, vector<1x64xf32>
    %23 = vector.broadcast %22 : vector<1x64xf32> to vector<16x64xf32>
    %24 = arith.mulf %21, %23 : vector<16x64xf32>
    %25 = arith.addf %20, %24 : vector<16x64xf32>
    %c1_18 = arith.constant 1 : index
    %c4_19 = arith.constant 4 : index
    %26 = vector.load %arg6[%c1_18, %c4_19] : memref<18x72xf32, #tpu.memory_space<vmem>>, vector<16x64xf32>
    %c4_20 = arith.constant 4 : index
    %c0_21 = arith.constant 0 : index
    %27 = vector.load %arg2[%c4_20, %c0_21] : memref<9x64xf32, #tpu.memory_space<vmem>>, vector<1x64xf32>
    %28 = vector.broadcast %27 : vector<1x64xf32> to vector<16x64xf32>
    %29 = arith.mulf %26, %28 : vector<16x64xf32>
    %30 = arith.addf %25, %29 : vector<16x64xf32>
    %c1_22 = arith.constant 1 : index
    %c8_23 = arith.constant 8 : index
    %31 = vector.load %arg6[%c1_22, %c8_23] : memref<18x72xf32, #tpu.memory_space<vmem>>, vector<16x64xf32>
    %c5 = arith.constant 5 : index
    %c0_24 = arith.constant 0 : index
    %32 = vector.load %arg2[%c5, %c0_24] : memref<9x64xf32, #tpu.memory_space<vmem>>, vector<1x64xf32>
    %33 = vector.broadcast %32 : vector<1x64xf32> to vector<16x64xf32>
    %34 = arith.mulf %31, %33 : vector<16x64xf32>
    %35 = arith.addf %30, %34 : vector<16x64xf32>
    %c2_25 = arith.constant 2 : index
    %c0_26 = arith.constant 0 : index
    %36 = vector.load %arg6[%c2_25, %c0_26] : memref<18x72xf32, #tpu.memory_space<vmem>>, vector<16x64xf32>
    %c6 = arith.constant 6 : index
    %c0_27 = arith.constant 0 : index
    %37 = vector.load %arg2[%c6, %c0_27] : memref<9x64xf32, #tpu.memory_space<vmem>>, vector<1x64xf32>
    %38 = vector.broadcast %37 : vector<1x64xf32> to vector<16x64xf32>
    %39 = arith.mulf %36, %38 : vector<16x64xf32>
    %40 = arith.addf %35, %39 : vector<16x64xf32>
    %c2_28 = arith.constant 2 : index
    %c4_29 = arith.constant 4 : index
    %41 = vector.load %arg6[%c2_28, %c4_29] : memref<18x72xf32, #tpu.memory_space<vmem>>, vector<16x64xf32>
    %c7 = arith.constant 7 : index
    %c0_30 = arith.constant 0 : index
    %42 = vector.load %arg2[%c7, %c0_30] : memref<9x64xf32, #tpu.memory_space<vmem>>, vector<1x64xf32>
    %43 = vector.broadcast %42 : vector<1x64xf32> to vector<16x64xf32>
    %44 = arith.mulf %41, %43 : vector<16x64xf32>
    %45 = arith.addf %40, %44 : vector<16x64xf32>
    %c2_31 = arith.constant 2 : index
    %c8_32 = arith.constant 8 : index
    %46 = vector.load %arg6[%c2_31, %c8_32] : memref<18x72xf32, #tpu.memory_space<vmem>>, vector<16x64xf32>
    %c8_33 = arith.constant 8 : index
    %c0_34 = arith.constant 0 : index
    %47 = vector.load %arg2[%c8_33, %c0_34] : memref<9x64xf32, #tpu.memory_space<vmem>>, vector<1x64xf32>
    %48 = vector.broadcast %47 : vector<1x64xf32> to vector<16x64xf32>
    %49 = arith.mulf %46, %48 : vector<16x64xf32>
    %50 = arith.addf %45, %49 : vector<16x64xf32>
    %c0_35 = arith.constant 0 : index
    %c0_36 = arith.constant 0 : index
    %51 = vector.load %arg3[%c0_35, %c0_36] : memref<1x64xf32, #tpu.memory_space<vmem>>, vector<1x64xf32>
    %52 = vector.broadcast %51 : vector<1x64xf32> to vector<16x64xf32>
    %53 = arith.addf %50, %52 : vector<16x64xf32>
    %c0_37 = arith.constant 0 : index
    %c0_38 = arith.constant 0 : index
    %54 = vector.load %arg4[%c0_37, %c0_38] : memref<64x128xf32, #tpu.memory_space<vmem>>, vector<64x128xf32>
    %cst_39 = arith.constant dense<0.000000e+00> : vector<16x128xf32>
    %55 = tpu.matmul %53, %54, %cst_39 {dimension_numbers = #tpu.dot_dimension_numbers<[1], [0], [0], [1], [0, 0, 1, 1], [], []>} : vector<16x64xf32>, vector<64x128xf32>, vector<16x128xf32> -> vector<16x128xf32>
    %c0_40 = arith.constant 0 : index
    %c0_41 = arith.constant 0 : index
    %c0_42 = arith.constant 0 : index
    %56 = vector.load %arg5[%c0_40, %c0_41, %c0_42] : memref<1x16x128xf32, #tpu.memory_space<vmem>>, vector<1x16x128xf32>
    %57 = vector.shape_cast %56 : vector<1x16x128xf32> to vector<16x128xf32>
    %58 = vector.shape_cast %55 : vector<16x128xf32> to vector<1x16x128xf32>
    tpu.vector_store %arg5[%c0_40, %c0_41, %c0_42], %58 {strides = array<i32>} : memref<1x16x128xf32, #tpu.memory_space<vmem>>, vector<1x16x128xf32>,
    return
  }
  func.func @transform_0(%arg0: i32) -> (i32, i32, i32) {
    %c0_i32 = arith.constant 0 : i32
    %c0_i32_0 = arith.constant 0 : i32
    %c0_i32_1 = arith.constant 0 : i32
    return %arg0, %c0_i32, %c0_i32_0 : i32, i32, i32
  }
  func.func @transform_1(%arg0: i32) -> (i32, i32) {
    %c0_i32 = arith.constant 0 : i32
    %c0_i32_0 = arith.constant 0 : i32
    %c0_i32_1 = arith.constant 0 : i32
    return %c0_i32, %c0_i32_0 : i32, i32
  }
  func.func @transform_2(%arg0: i32) -> (i32, i32) {
    %c0_i32 = arith.constant 0 : i32
    %c0_i32_0 = arith.constant 0 : i32
    %c0_i32_1 = arith.constant 0 : i32
    return %c0_i32, %c0_i32_0 : i32, i32
  }
  func.func @transform_3(%arg0: i32) -> (i32, i32) {
    %c0_i32 = arith.constant 0 : i32
    %c0_i32_0 = arith.constant 0 : i32
    %c0_i32_1 = arith.constant 0 : i32
    return %c0_i32, %c0_i32_0 : i32, i32
  }
  func.func @transform_4(%arg0: i32) -> (i32, i32, i32) {
    %c0_i32 = arith.constant 0 : i32
    %c0_i32_0 = arith.constant 0 : i32
    %c0_i32_1 = arith.constant 0 : i32
    return %arg0, %c0_i32, %c0_i32_0 : i32, i32, i32
  }
}

</mosaic_0001>

<bundles_post_ra>
// kernel: tile.17
= control target key start
LH: loop header
LB: loop body
LE: loop exit
PB: predicated region body
PF: predicated region fallthrough
CT: control target
= control target key end

     0   :  { %s131_s10 = smov 60   ;;  %s132_s11 = smov 52   ;;  %vm3_vm0 = vcmask 31744   ;;  %vm9_vm1 = vcmask 523744   ;;  %vm15_vm2 = vcmask 490944   ;;  %vm21_vm3 = vcmask 458144   ;;  %s207_s0 = inlined_call_operand.vmem [shape: f32[16,4], index: 0, kind: input, shape index: {}]   ;;  %s208_s1 = inlined_call_operand.vmem [shape: f32[1,64], index: 1, kind: output, shape index: {}]  }
   0x1   :  { %v101_v0 = vld [vmem:[%s207_s0 + $0xf] sm:$0x1]   ;;  %v103_v1 = vld [vmem:[%s207_s0 + $0xd] sm:$0x1]   ;;  %v102_v2 = vld [vmem:[%s207_s0 + $0xe] sm:$0x1]  }
   0x2   :  { %7 = vrot.lane.b32.xlu0 %v101_v0, %s131_s10  ;;  %19 = vrot.lane.b32.xlu1 %v103_v1, %s132_s11  ;;  %v104_v3 = vld [vmem:[%s207_s0 + $0xc] sm:$0x1]   ;;  %s133_s16 = smov 56   ;;  %s134_s17 = smov 48   ;;  %v105_v4 = vld [vmem:[%s207_s0 + $0xb] sm:$0x1]  }
   0x3   :  { %v106_v5 = vld [vmem:[%s207_s0 + $0xa] sm:$0x1]   ;;  %v2_v6 = vld [vmem:[%s207_s0] sm:$0x1]   ;;  %s135_s24 = smov 44   ;;  %s136_s25 = smov 40  }
   0x4   :  { %4 = vst.msk [vmem:[#allocation0] sm:$0x1] %vm3_vm0, %v2_v6   ;;  %v107_v7 = vld [vmem:[%s207_s0 + $0x9] sm:$0x1]   ;;  %v108_v8 = vld [vmem:[%s207_s0 + $0x8] sm:$0x1]  }
   0x5   :  { %s137_s30 = smov 36   ;;  %s138_s2 = smov 32   ;;  %v109_v9 = vld [vmem:[%s207_s0 + $0x7] sm:$0x1]   ;;  %v110_v10 = vld [vmem:[%s207_s0 + $0x6] sm:$0x1]  }
   0x6   :  { %13 = vrot.lane.b32.xlu0 %v102_v2, %s133_s16  ;;  %25 = vrot.lane.b32.xlu1 %v104_v3, %s134_s17  ;;  %s139_s7 = smov 28   ;;  %s140_s8 = smov 24   ;;  %v111_v11 = vld [vmem:[%s207_s0 + $0x5] sm:$0x1]   ;;  %v112_v12 = vld [vmem:[%s207_s0 + $0x4] sm:$0x1]  }
   0x7   :  { %s141_s13 = smov 20   ;;  %s142_s14 = smov 16   ;;  %v113_v13 = vld [vmem:[%s207_s0 + $0x3] sm:$0x1]   ;;  %v114_v14 = vld [vmem:[%s207_s0 + $0x2] sm:$0x1]  }
   0x8   :  { %s143_s19 = smov 12   ;;  %s144_s20 = smov 8   ;;  %v115_v15 = vld [vmem:[%s207_s0 + $0x1] sm:$0x1]   ;;  %vm27_vm4 = vcmask 425344   ;;  %vm33_vm5 = vcmask 392544  }
   0x9   :  { %s145_s0 = smov 4   ;;  %vm39_vm6 = vcmask 359744   ;;  %vm45_vm7 = vcmask 326944   ;;  %vm51_vm8 = vcmask 294144   ;;  %vm57_vm9 = vcmask 261344  }
   0xa   :  { %31 = vrot.lane.b32.xlu0 %v105_v4, %s135_s24  ;;  %37 = vrot.lane.b32.xlu1 %v106_v5, %s136_s25  ;;  %vm63_vm10 = vcmask 228544   ;;  %vm69_vm11 = vcmask 195744   ;;  %vm75_vm12 = vcmask 162944   ;;  %vm81_vm13 = vcmask 130144  }
   0xb   :  { %vm87_vm14 = vcmask 97344   ;;  %vm93_vm15 = vcmask 64544  }
   0xe   :  { %43 = vrot.lane.b32.xlu0 %v107_v7, %s137_s30  ;;  %49 = vrot.lane.b32.xlu1 %v108_v8, %s138_s2 }
  0x12   :  { %55 = vrot.lane.b32.xlu0 %v109_v9, %s139_s7  ;;  %61 = vrot.lane.b32.xlu1 %v110_v10, %s140_s8 }
  0x16   :  { %67 = vrot.lane.b32.xlu0 %v111_v11, %s141_s13  ;;  %73 = vrot.lane.b32.xlu1 %v112_v12, %s142_s14 }
  0x1a   :  { %79 = vrot.lane.b32.xlu0 %v113_v13, %s143_s19  ;;  %85 = vrot.lane.b32.xlu1 %v114_v14, %s144_s20 }
  0x1e   :  { %91 = vrot.lane.b32.xlu0 %v115_v15, %s145_s0 }
  0x74   :  { %v8_v16 = vpop.permute.xlu0 %7   ;;  %v20_v17 = vpop.permute.xlu1 %19  }
  0x75   :  { %10 = vst.msk [vmem:[#allocation0] sm:$0x1] %vm9_vm1, %v8_v16  }
  0x78   :  { %v14_v18 = vpop.permute.xlu0 %13   ;;  %v26_v19 = vpop.permute.xlu1 %25  }
  0x79   :  { %16 = vst.msk [vmem:[#allocation0] sm:$0x1] %vm15_vm2, %v14_v18  }
  0x7a   :  { %22 = vst.msk [vmem:[#allocation0] sm:$0x1] %vm21_vm3, %v20_v17  }
  0x7b   :  { %28 = vst.msk [vmem:[#allocation0] sm:$0x1] %vm27_vm4, %v26_v19  }
  0x7c   :  { %v32_v20 = vpop.permute.xlu0 %31   ;;  %v38_v21 = vpop.permute.xlu1 %37  }
  0x7d   :  { %34 = vst.msk [vmem:[#allocation0] sm:$0x1] %vm33_vm5, %v32_v20  }
  0x7e   :  { %40 = vst.msk [vmem:[#allocation0] sm:$0x1] %vm39_vm6, %v38_v21  }
  0x80   :  { %v44_v22 = vpop.permute.xlu0 %43   ;;  %v50_v23 = vpop.permute.xlu1 %49  }
  0x81   :  { %46 = vst.msk [vmem:[#allocation0] sm:$0x1] %vm45_vm7, %v44_v22  }
  0x82   :  { %52 = vst.msk [vmem:[#allocation0] sm:$0x1] %vm51_vm8, %v50_v23  }
  0x84   :  { %v56_v24 = vpop.permute.xlu0 %55   ;;  %v62_v25 = vpop.permute.xlu1 %61  }
  0x85   :  { %58 = vst.msk [vmem:[#allocation0] sm:$0x1] %vm57_vm9, %v56_v24  }
  0x86   :  { %64 = vst.msk [vmem:[#allocation0] sm:$0x1] %vm63_vm10, %v62_v25  }
  0x88   :  { %v68_v26 = vpop.permute.xlu0 %67   ;;  %v74_v27 = vpop.permute.xlu1 %73  }
  0x89   :  { %70 = vst.msk [vmem:[#allocation0] sm:$0x1] %vm69_vm11, %v68_v26  }
  0x8a   :  { %76 = vst.msk [vmem:[#allocation0] sm:$0x1] %vm75_vm12, %v74_v27  }
  0x8c   :  { %v80_v28 = vpop.permute.xlu0 %79   ;;  %v86_v29 = vpop.permute.xlu1 %85  }
  0x8d   :  { %82 = vst.msk [vmem:[#allocation0] sm:$0x1] %vm81_vm13, %v80_v28  }
  0x8e   :  { %88 = vst.msk [vmem:[#allocation0] sm:$0x1] %vm87_vm14, %v86_v29  }
  0x90   :  { %v92_v30 = vpop.permute.xlu0 %91  }
  0x91   :  { %94 = vst.msk [vmem:[#allocation0] sm:$0x1] %vm93_vm15, %v92_v30  }
  0x98   :  { %v98_v31 = vld [vmem:[#allocation0] sm:$0x1] }
  0x99   :  { %100 = vst [vmem:[%s208_s1] sm:$0x1] %v98_v31 }

// kernel: tile.16
= control target key start
LH: loop header
LB: loop body
LE: loop exit
PB: predicated region body
PF: predicated region fallthrough
CT: control target
= control target key end

     0   :  { %s28_s0 = inlined_call_operand.vmem [shape: f32[4], index: 0, kind: input, shape index: {}]   ;;  %s29_s1 = inlined_call_operand.vmem [shape: f32[16,4], index: 1, kind: output, shape index: {}]  }
   0x1   :  { %v4_v0 = vld [vmem:[%s28_s0] ss:$0 sm:$0xff] }
   0x2   :  { %5 = vst [vmem:[%s29_s1] sm:$0xff] %v4_v0  ;;  %8 = vst [vmem:[%s29_s1 + $0x8] sm:$0xff] %v4_v0 }

// kernel: separable_conv2d.1
= control target key start
LH: loop header
LB: loop body
LE: loop exit
PB: predicated region body
PF: predicated region fallthrough
CT: control target
= control target key end

     0   :  { %s652_s15 = smov 0   ;;  %s742_s0 = inlined_call_operand.vmem [shape: f32[2,16,64], index: 0, kind: input, shape index: {}]   ;;  %s743_s1 = inlined_call_operand.vmem [shape: f32[9,64], index: 1, kind: input, shape index: {}]   ;;  %s744_s2 = inlined_call_operand.vmem [shape: f32[1,64], index: 2, kind: input, shape index: {}]   ;;  %s745_s3 = inlined_call_operand.vmem [shape: f32[64,128], index: 3, kind: input, shape index: {}]   ;;  %s746_s4 = inlined_call_operand.vmem [shape: f32[2,16,128], index: 4, kind: output, shape index: {}]  }
   0x1 LB: > { %s531_s16 = sadd.s32 4294967295, %s620_s15   ;;  %p535_p0 = scmp.ge.s32.totalorder %s620_s15, 1  ;;  %s620_s15 = sphi %s652_s15, %s14_s15  }
   0x2   : > { %p162_p1 = scmp.lt.s32.totalorder %s620_s15, 3 }
   0x4   : > { %p163_p2 = pnand %p535_p0, %p162_p1 }
   0x5   : > { %v541_v0 = vld [vmem:[%s743_s1 + $0x1] ss:$0 sm:$0xff] (!%p163_p2)  ;;  %p188_p3 = scmp.lt.s32.totalorder (!%p163_p2), %s531_s16, 1  ;;  %s622_s19 = smov (!%p163_p2), 4   ;;  %vm198_vm0 = vcmask (!%p163_p2), 588800   ;;  %v623_v2 = vmov (!%p163_p2), 0.0  }
   0x6   : > { %166 = sbr.rel (%p163_p2) target bundleno = 499 (0x1f3), region = 36  ;;  %233 = vrot.lane.b32.xlu1 (!%p163_p2), %v541_v0, %s622_s19  ;;  %v542_v1 = vld [vmem:[%s743_s1 + $0x2] ss:$0 sm:$0xff] (!%p163_p2)  ;;  %199 = vst.msk [vmem:[#allocation2] sm:$0xff] (!%p163_p2), %vm198_vm0, %v623_v2  ;;  %200 = vst.msk [vmem:[#allocation2 + $0x8] sm:$0xff] (!%p163_p2), %vm198_vm0, %v623_v2  ;;  %vm201_vm1 = vcmask (!%p163_p2), 582656  }
   0x7   : > { %202 = vst.msk [vmem:[#allocation2 + $0x10] sm:$0x3] (!%p163_p2), %vm201_vm1, %v623_v2  ;;  %s624_s26 = smov (!%p163_p2), 8   ;;  %v545_v4 = vld [vmem:[%s743_s1 + $0x5] ss:$0 sm:$0xff] (!%p163_p2)  ;;  %vm213_vm2 = vcmask (!%p163_p2), 556064  }
   0x8   : > { %v548_v6 = vld [vmem:[%s743_s1 + $0x8] ss:$0 sm:$0xff] (!%p163_p2)  ;;  %v544_v7 = vld [vmem:[%s743_s1 + $0x4] ss:$0 sm:$0xff] (!%p163_p2)  ;;  %v547_v8 = vld [vmem:[%s743_s1 + $0x7] ss:$0 sm:$0xff] (!%p163_p2) }
   0x9   : > { %v384_v14 = vld [vmem:[%s745_s3] sm:$0xff] (!%p163_p2)  ;;  %v385_v15 = vld [vmem:[%s745_s3 + $0x8] sm:$0xff] (!%p163_p2)  ;;  %s625_s13 = smov (!%p163_p2), 124   ;;  %v386_v20 = vld [vmem:[%s745_s3 + $0x10] sm:$0xff] (!%p163_p2)  ;;  %s626_s20 = smov (!%p163_p2), 120   ;;  %vm392_vm3 = vcmask (!%p163_p2), 523264  }
   0xa   : > { %254 = vrot.lane.b32.xlu1 (!%p163_p2), %v542_v1, %s624_s26  ;;  %v585_v16 = vpack.c.bf16 (!%p163_p2), %v385_v15, %v384_v14  ;;  %v387_v21 = vld [vmem:[%s745_s3 + $0x18] sm:$0xff] (!%p163_p2)  ;;  %v388_v29 = vld [vmem:[%s745_s3 + $0x20] sm:$0xff] (!%p163_p2)  ;;  %v389_v30 = vld [vmem:[%s745_s3 + $0x28] sm:$0xff] (!%p163_p2) }
   0xb   : > { %v589_v25 = vpack.c.bf16 (!%p163_p2), %v387_v21, %v386_v20  ;;  %v593_v32 = vpack.c.bf16 (!%p163_p2), %v389_v30, %v388_v29  ;;  %v390_v37 = vld [vmem:[%s745_s3 + $0x30] sm:$0xff] (!%p163_p2)  ;;  %v391_v38 = vld [vmem:[%s745_s3 + $0x38] sm:$0xff] (!%p163_p2)  ;;  %v540_v47 = vld [vmem:[%s743_s1] ss:$0 sm:$0xff] (!%p163_p2) }
   0xc   : > { %586 = vmatprep.subr.bf16.mxu0 (!%p163_p2), %v585_v16  ;;  %v597_v39 = vpack.c.bf16 (!%p163_p2), %v391_v38, %v390_v37  ;;  %v543_v50 = vld [vmem:[%s743_s1 + $0x3] ss:$0 sm:$0xff] (!%p163_p2)  ;;  %v546_v63 = vld [vmem:[%s743_s1 + $0x6] ss:$0 sm:$0xff] (!%p163_p2)  ;;  %v549_v15 = vld [vmem:[%s744_s2] ss:$0 sm:$0xff] (!%p163_p2) }
   0xd   : > { %s748_s16 = smov (!%p188_p3, %s531_s16), 1  ;;  %588 = vmatpush3.bf16.msra.mxu0 %v585_v16 }
   0xe   : > { %s554_s22 = sshll.u32 %s748_s16, 4  ;;  %307 = vrot.lane.b32.xlu1 %v545_v4, %s624_s26  ;;  %590 = vmatprep.subr.bf16.mxu0 %v589_v25 }
   0xf   : > { %s192_s25 = scalar_lea.vmem %s742_s0, %s554_s22  ;;  %s197_s14 = scalar_lea.vmem %s746_s4, %s554_s22 }
  0x10   : > { %v203_v3 = vld [vmem:[%s192_s25] sm:$0xff]  ;;  %v204_v5 = vld [vmem:[%s192_s25 + $0x8] sm:$0xff] }
  0x11   : > { %207 = vrot.lane.b32.xlu0 %v203_v3, %s622_s19  ;;  %592 = vmatpush3.bf16.msra.mxu0 %v589_v25 }
  0x12   : > { %360 = vrot.lane.b32.xlu1 %v548_v6, %s624_s26  ;;  %594 = vmatprep.subr.bf16.mxu0 %v593_v32 }
  0x15   : > { %209 = vrot.lane.b32.xlu0 %v204_v5, %s622_s19  ;;  %596 = vmatpush3.bf16.msra.mxu0 %v593_v32 }
  0x16   : > { %598 = vmatprep.subr.bf16.mxu0 %v597_v39 }
  0x19   : > { %286 = vrot.lane.b32.xlu0 %v544_v7, %s622_s19  ;;  %600 = vmatpush3.bf16.msra.mxu0 %v597_v39 }
  0x1d   : > { %339 = vrot.lane.b32.xlu0 %v547_v8, %s622_s19 }
  0x78   : > { %v234_v11 = vpop.permute.xlu1 %233 }
  0x7c   : > { %v255_v17 = vpop.permute.xlu1 %254 }
  0x80   : > { %v308_v27 = vpop.permute.xlu1 %307 }
  0x83   : > { %v208_v9 = vpop.permute.xlu0 %207 }
  0x84   : > { %214 = vst.msk [vmem:[#allocation2 + $0x1] sm:$0xff] %vm213_vm2, %v208_v9  ;;  %v361_v42 = vpop.permute.xlu1 %360 }
  0x87   : > { %v210_v10 = vpop.permute.xlu0 %209 }
  0x88   : > { %215 = vst.msk [vmem:[#allocation2 + $0x9] sm:$0xff] %vm213_vm2, %v210_v10 }
  0x8b   : > { %v216_v12 = vld [vmem:[#allocation2] sm:$0xff]  ;;  %v287_v23 = vpop.permute.xlu0 %286 }
  0x8c   : > { %v236_v13 = vmul.f32 %v234_v11, %v216_v12  ;;  %v257_v18 = vmul.f32 %v255_v17, %v216_v12  ;;  %v269_v22 = vld [vmem:[#allocation2 + $0x1] sm:$0xff]  ;;  %v223_v49 = vmul.f32 %v540_v47, %v216_v12 }
  0x8d   : > { %v289_v26 = vmul.f32 %v287_v23, %v269_v22  ;;  %v310_v33 = vmul.f32 %v308_v27, %v269_v22  ;;  %v276_v55 = vmul.f32 %v543_v50, %v269_v22 }
  0x8e   : > { %240 = vrot.lane.b32.xlu0 %v236_v13, %s625_s13 }
  0x8f   : > { %v217_v19 = vld [vmem:[#allocation2 + $0x8] sm:$0xff]  ;;  %v340_v36 = vpop.permute.xlu0 %339 }
  0x90   : > { %v237_v24 = vmul.f32 %v234_v11, %v217_v19  ;;  %v258_v28 = vmul.f32 %v255_v17, %v217_v19  ;;  %v270_v31 = vld [vmem:[#allocation2 + $0x9] sm:$0xff]  ;;  %v224_v56 = vmul.f32 %v540_v47, %v217_v19 }
  0x91   : > { %v290_v34 = vmul.f32 %v287_v23, %v270_v31  ;;  %v322_v35 = vld [vmem:[#allocation2 + $0x2] sm:$0xff]  ;;  %v311_v41 = vmul.f32 %v308_v27, %v270_v31  ;;  %v323_v43 = vld [vmem:[#allocation2 + $0xa] sm:$0xff]  ;;  %v277_v62 = vmul.f32 %v543_v50, %v270_v31 }
  0x92   : > { %261 = vrot.lane.b32.xlu0 %v257_v18, %s626_s20  ;;  %242 = vrot.lane.b32.xlu1 %v237_v24, %s625_s13  ;;  %v342_v40 = vmul.f32 %v340_v36, %v322_v35  ;;  %v363_v44 = vmul.f32 %v361_v42, %v322_v35  ;;  %v343_v45 = vmul.f32 %v340_v36, %v323_v43 }
  0x93   : > { %v364_v46 = vmul.f32 %v361_v42, %v323_v43  ;;  %v329_v5 = vmul.f32 %v546_v63, %v322_v35  ;;  %v330_v11 = vmul.f32 %v546_v63, %v323_v43 }
  0x96   : > { %293 = vrot.lane.b32.xlu0 %v289_v26, %s625_s13  ;;  %263 = vrot.lane.b32.xlu1 %v258_v28, %s626_s20 }
  0x9a   : > { %314 = vrot.lane.b32.xlu0 %v310_v33, %s626_s20  ;;  %295 = vrot.lane.b32.xlu1 %v290_v34, %s625_s13 }
  0x9e   : > { %346 = vrot.lane.b32.xlu0 %v342_v40, %s625_s13  ;;  %316 = vrot.lane.b32.xlu1 %v311_v41, %s626_s20 }
  0xa2   : > { %367 = vrot.lane.b32.xlu0 %v363_v44, %s626_s20  ;;  %348 = vrot.lane.b32.xlu1 %v343_v45, %s625_s13 }
  0xa6   : > { %369 = vrot.lane.b32.xlu1 %v364_v46, %s626_s20 }
 0x100   : > { %v241_v48 = vpop.permute.xlu0 %240 }
 0x101   : > { %v246_v51 = vadd.f32 %v241_v48, %v223_v49 }
 0x104   : > { %v262_v52 = vpop.permute.xlu0 %261  ;;  %v243_v53 = vpop.permute.xlu1 %242 }
 0x105   : > { %v267_v54 = vadd.f32 %v262_v52, %v246_v51  ;;  %v247_v58 = vadd.f32 %v243_v53, %v224_v56 }
 0x107   : > { %v278_v57 = vadd.f32 %v276_v55, %v267_v54 }
 0x108   : > { %v294_v59 = vpop.permute.xlu0 %293  ;;  %v264_v60 = vpop.permute.xlu1 %263 }
 0x109   : > { %v268_v61 = vadd.f32 %v264_v60, %v247_v58  ;;  %v299_v0 = vadd.f32 %v294_v59, %v278_v57 }
 0x10b   : > { %v279_v1 = vadd.f32 %v277_v62, %v268_v61 }
 0x10c   : > { %v315_v2 = vpop.permute.xlu0 %314  ;;  %v296_v3 = vpop.permute.xlu1 %295 }
 0x10d   : > { %v320_v4 = vadd.f32 %v315_v2, %v299_v0  ;;  %v300_v7 = vadd.f32 %v296_v3, %v279_v1 }
 0x10f   : > { %v331_v6 = vadd.f32 %v329_v5, %v320_v4 }
 0x110   : > { %v347_v8 = vpop.permute.xlu0 %346  ;;  %v317_v9 = vpop.permute.xlu1 %316 }
 0x111   : > { %v321_v10 = vadd.f32 %v317_v9, %v300_v7  ;;  %v352_v12 = vadd.f32 %v347_v8, %v331_v6 }
 0x113   : > { %v332_v13 = vadd.f32 %v330_v11, %v321_v10 }
 0x114   : > { %v368_v14 = vpop.permute.xlu0 %367  ;;  %v349_v16 = vpop.permute.xlu1 %348 }
 0x115   : > { %v373_v17 = vadd.f32 %v368_v14, %v352_v12  ;;  %v353_v19 = vadd.f32 %v349_v16, %v332_v13 }
 0x117   : > { %v382_v18 = vadd.f32 %v549_v15, %v373_v17 }
 0x118   : > { %v370_v20 = vpop.permute.xlu1 %369 }
 0x119   : > { %582 = vmatprep.mubr.msk.f32.mxu0 %vm392_vm3, %v382_v18  ;;  %v374_v21 = vadd.f32 %v370_v20, %v353_v19 }
 0x11b   : > { %v383_v22 = vadd.f32 %v549_v15, %v374_v21 }
 0x11d   : > { %583 = vmatmul.mubr.msk.f32.vlgmr.msra.gmra.mrb[0].mxu0 %vm392_vm3, %v383_v22 }
 0x1f0   : > { %v584_v23 = vpop.f32.mrb[0].mxu0 }
 0x1f1   : > { %475 = vst [vmem:[%s197_s14 + $0x8] sm:$0xff] %v584_v23  ;;  %v465_v24 = vpop.f32.mrb[1].mxu0 }
 0x1f2   : > { %474 = vst [vmem:[%s197_s14] sm:$0xff] %v465_v24 }
 0x1f3 PF: > { %s14_s15 = sadd.s32 1, %s620_s15  }
 0x1f4   : > { %p11_p4 = scmp.ge.s32.totalorder %s14_s15, 4  }
 0x1f6   :  { %13 = sbr.rel (!%p11_p4) target bundleno = 1 (0x1), region = 66 }

</bundles_post_ra>
